<compile_context>
chip_gen: v6e
topology: v6e:2x2x1
jax: 0.10.0
libtpu: 0.0.40
codegen_flags: <defaults>
</compile_context>

<pallas_src>
import functools

import jax
import jax.numpy as jnp
from jax.experimental import pallas as pl
from jax.experimental.pallas import tpu as pltpu


def _round_up(v, m):
    return -(-v // m) * m


def _acc_add(acc_ref, idx, x):
    """Accumulate a (rows, lanes) f32 tile into acc_ref[idx] ((8, 128) f32).

    Only vreg-aligned VPU adds; no cross-lane/sublane reductions per tile.
    """
    rows, lanes = x.shape
    x = x.astype(jnp.float32)
    full = (rows // 8) * 8
    if full:
        part = x[:full].reshape(full // 8, 8, lanes)
        part = jnp.sum(part, axis=0) if full > 8 else part[0]
        if lanes == 128:
            acc_ref[idx] += part
        else:
            acc_ref[idx, :, :lanes] += part
    rem = rows - full
    if rem:
        acc_ref[idx, :rem, :lanes] += x[full:]


def _loss_kernel(logits_ref, mask_ref, cl1_ref, cl2_ref, cc1_ref, cc2_ref,
                 out_ref, acc_ref, *,
                 g_inner, n_rows, t_n,
                 cl_rows, t_cl, cc_rows, t_cc,
                 d_cl, d_cc, A, CL, CC, CC_type, contrastive, cllambda):
    c = pl.program_id(0)              # core slice ("parallel" -> megacore on v7x)
    i = pl.program_id(1)              # streaming step within the slice
    gi = c * g_inner + i              # global block index of this step

    @pl.when(i == 0)
    def _init():
        acc_ref[...] = jnp.zeros_like(acc_ref)

    # Static: can this stream's window ever run past its data?
    logits_may_mask = 2 * g_inner * t_n > n_rows
    cl_may_mask = 2 * g_inner * t_cl > cl_rows
    cc_may_mask = 2 * g_inner * t_cc > cc_rows

    def _rows_valid(tile, total):
        r = jax.lax.broadcasted_iota(jnp.int32, (tile, 1), 0) + gi * tile
        return r < total

    def _accumulate(masked):
        # ---- InfoNCE, folded:  per_row = sum(mask)*(m+lse) - sum(mask*logits)
        logits = logits_ref[...].astype(jnp.float32)
        lmask = mask_ref[...].astype(jnp.float32)
        m = jnp.max(logits, axis=1, keepdims=True)
        lse = jnp.log(jnp.sum(jnp.exp(logits - m), axis=1, keepdims=True))
        per_row = (jnp.sum(lmask, axis=1, keepdims=True) * (m + lse)
                   - jnp.sum(lmask * logits, axis=1, keepdims=True))
        if masked and logits_may_mask:
            # Select (not multiply) so garbage NaN/Inf rows cannot propagate.
            per_row = jnp.where(_rows_valid(t_n, n_rows), per_row, 0.0)
        _acc_add(acc_ref, 0, per_row)

        cl_valid = _rows_valid(t_cl, cl_rows) if (masked and cl_may_mask) else None
        cc_valid = _rows_valid(t_cc, cc_rows) if (masked and cc_may_mask) else None

        def _sq(u, v, valid):
            d = u - v
            if valid is not None:
                d = jnp.where(valid, d, 0.0)
            return d * d

        # ---- CL (MSE) partial sums; each operand loaded from VMEM once.
        a1 = cl1_ref[0].astype(jnp.float32)
        b1 = cl1_ref[1].astype(jnp.float32)
        a2 = cl2_ref[0].astype(jnp.float32)
        b2 = cl2_ref[1].astype(jnp.float32)
        _acc_add(acc_ref, 1, _sq(a1, b1, cl_valid))
        _acc_add(acc_ref, 2, _sq(a2, b2, cl_valid))
        if contrastive:
            _acc_add(acc_ref, 3, _sq(a1, b2, cl_valid))
            _acc_add(acc_ref, 4, _sq(a2, b1, cl_valid))

        # ---- CC distance partial sums.
        c1a = cc1_ref[0].astype(jnp.float32)
        c1b = cc1_ref[1].astype(jnp.float32)
        c2a = cc2_ref[0].astype(jnp.float32)
        c2b = cc2_ref[1].astype(jnp.float32)
        if CC_type == 'l1':
            def _dis(u, v, valid):
                d = jnp.abs(u - v)
                return jnp.where(valid, d, 0.0) if valid is not None else d
        elif CC_type == 'l2':
            _dis = _sq
        else:  # 'cos': mean over rows of per-row dot == sum(products) / N
            def _dis(u, v, valid):
                p = u * v
                return jnp.where(valid, p, 0.0) if valid is not None else p
        _acc_add(acc_ref, 5, _dis(c1a, c1b, cc_valid))
        _acc_add(acc_ref, 6, _dis(c2a, c2b, cc_valid))

    if logits_may_mask or cl_may_mask or cc_may_mask:
        conds = []
        if logits_may_mask:
            conds.append((gi + 1) * t_n > n_rows)
        if cl_may_mask:
            conds.append((gi + 1) * t_cl > cl_rows)
        if cc_may_mask:
            conds.append((gi + 1) * t_cc > cc_rows)
        cond = conds[0]
        for extra in conds[1:]:
            cond = jnp.logical_or(cond, extra)

        @pl.when(cond)                        # tail / out-of-range step
        def _masked():
            _accumulate(True)

        @pl.when(jnp.logical_not(cond))       # full tiles: zero select cost
        def _fast():
            _accumulate(False)
    else:
        _accumulate(False)

    # ---- finalize this core slice: global means + contrastive + weighting.
    @pl.when(i == g_inner - 1)
    def _finalize():
        n_f = jnp.float32(n_rows)
        nd_cl = jnp.float32(n_rows * d_cl)
        cc_div = n_f if CC_type == 'cos' else jnp.float32(n_rows * d_cc)
        aloss = jnp.sum(acc_ref[0]) / n_f
        cl1 = jnp.sum(acc_ref[1]) / nd_cl
        cl2 = jnp.sum(acc_ref[2]) / nd_cl
        if contrastive:
            cl1 = cl1 - cllambda * (jnp.sum(acc_ref[3]) / nd_cl)
            cl2 = cl2 - cllambda * (jnp.sum(acc_ref[4]) / nd_cl)
        cl_loss = 0.5 * (cl1 + cl2)
        cc_dis = 0.5 * (jnp.sum(acc_ref[5]) + jnp.sum(acc_ref[6])) / cc_div
        aloss_w = A * aloss
        cl_w = CL * cl_loss
        cc_w = CC * cc_dis
        total = aloss_w + cl_w + cc_w
        lane = jax.lax.broadcasted_iota(jnp.int32, (8, 128), 1)
        out_ref[0] = (jnp.where(lane == 0, total, 0.0)
                      + jnp.where(lane == 1, aloss_w, 0.0)
                      + jnp.where(lane == 2, cl_w, 0.0)
                      + jnp.where(lane == 3, cc_w, 0.0))


# --------------------------- wrapper-side helpers ---------------------------

def _vmem_limit_bytes():
    try:
        phys = int(pltpu.get_tpu_info().vmem_capacity_bytes)
    except Exception:
        phys = 64 * 1024 * 1024
    # Stay within a single TensorCore's VMEM on every generation (v7x has
    # 64 MiB per core even if the chip-level figure is larger) + headroom.
    return max(16 * 1024 * 1024, min(phys * 3 // 4, 48 * 1024 * 1024))


def _sublane_pack(dtype):
    return 8 * max(1, 4 // jnp.dtype(dtype).itemsize)


def _block_bytes(lead, rows, lanes, dtype):
    it = jnp.dtype(dtype).itemsize
    return (lead * _round_up(max(rows, 1), _sublane_pack(dtype))
            * _round_up(lanes, 128) * it)


def _tile_for(rows, num_blocks):
    return min(rows, _round_up(-(-rows // num_blocks), 8))


def _choose_tiles(N, C, cl_rows, cl_lanes, cc_rows, cc_lanes,
                  dt_logits, dt_mask, dt_cl, dt_cc, vmem_limit):
    """Pick (steps-per-core, tiles) so double-buffered blocks fit the VMEM
    budget, with lane (128) and sublane (8/16/32) padding accounted for."""
    n_buf = 2
    budget = max(2 * 1024 * 1024, vmem_limit - 4 * 1024 * 1024)
    g_half = 1
    while True:
        nb = 2 * g_half
        t_n = _tile_for(N, nb)
        t_cl = _tile_for(cl_rows, nb)
        t_cc = _tile_for(cc_rows, nb)
        step = (_block_bytes(1, t_n, C, dt_logits)
                + _block_bytes(1, t_n, C, dt_mask)
                + 2 * _block_bytes(2, t_cl, cl_lanes, dt_cl)
                + 2 * _block_bytes(2, t_cc, cc_lanes, dt_cc))
        if n_buf * step <= budget or (t_n <= 8 and t_cl <= 8 and t_cc <= 8):
            return g_half, t_n, t_cl, t_cc
        g_half *= 2


def _pack_pair(x):
    """(2, N, D) -> lane-dense (2, N*D//128, 128) when the flattened slice is a
    multiple of 128 (free reshape of a contiguous array); else keep rows."""
    _, n, d = x.shape
    p = n * d
    if p % 128 == 0:
        return x.reshape(2, p // 128, 128)
    return x


def cep_loss(Alogits, mask, CL_1, CL_2, CC_1, CC_2, *,
             A=1.0, CL=1.0, CC=1.0, CC_type='l1',
             contrastive=False, cllambda=0.5):
    """Fused Pallas-TPU forward of `Loss`; returns (loss, Aloss, CLLoss, CC_dis)."""
    assert CC_type in ('l1', 'l2', 'cos')
    N, C = Alogits.shape
    assert mask.shape == (N, C)
    d_cl = CL_1.shape[2]
    d_cc = CC_1.shape[2]
    assert CL_1.shape == (2, N, d_cl) and CL_2.shape == (2, N, d_cl)
    assert CC_1.shape == (2, N, d_cc) and CC_2.shape == (2, N, d_cc)

    cl1 = _pack_pair(CL_1)
    cl2 = _pack_pair(CL_2)
    cc1 = _pack_pair(CC_1)
    cc2 = _pack_pair(CC_2)
    _, cl_rows, cl_lanes = cl1.shape
    _, cc_rows, cc_lanes = cc1.shape

    vmem_limit = _vmem_limit_bytes()
    g_inner, t_n, t_cl, t_cc = _choose_tiles(
        N, C, cl_rows, cl_lanes, cc_rows, cc_lanes,
        Alogits.dtype, mask.dtype, cl1.dtype, cc1.dtype, vmem_limit)

    nb_n = -(-N // t_n)
    nb_cl = -(-cl_rows // t_cl)
    nb_cc = -(-cc_rows // t_cc)

    # Each stream is streamed at its own rate over the shared (2, G) grid; the
    # clamp keeps block starts in-bounds, masking zeroes out-of-range steps.
    def _map2(nblocks):
        last = nblocks - 1
        return lambda c, i: (jnp.minimum(c * g_inner + i, last), 0)

    def _map3(nblocks):
        last = nblocks - 1
        return lambda c, i: (0, jnp.minimum(c * g_inner + i, last), 0)

    kernel = functools.partial(
        _loss_kernel,
        g_inner=g_inner, n_rows=N, t_n=t_n,
        cl_rows=cl_rows, t_cl=t_cl, cc_rows=cc_rows, t_cc=t_cc,
        d_cl=d_cl, d_cc=d_cc,
        A=float(A), CL=float(CL), CC=float(CC), CC_type=CC_type,
        contrastive=bool(contrastive), cllambda=float(cllambda))

    total_bytes = sum(int(x.size) * x.dtype.itemsize
                      for x in (Alogits, mask, CL_1, CL_2, CC_1, CC_2))
    n_cl_pairs = 4 if contrastive else 2
    flops = 6 * N * C + 3 * n_cl_pairs * N * d_cl + 3 * 2 * N * d_cc
    cost = pl.CostEstimate(flops=int(flops), transcendentals=int(N * C),
                           bytes_accessed=int(total_bytes))

    out = pl.pallas_call(
        kernel,
        out_shape=jax.ShapeDtypeStruct((2, 8, 128), jnp.float32),
        grid_spec=pltpu.PrefetchScalarGridSpec(
            num_scalar_prefetch=0,
            grid=(2, g_inner),
            in_specs=[
                pl.BlockSpec((t_n, C), _map2(nb_n)),
                pl.BlockSpec((t_n, C), _map2(nb_n)),
                pl.BlockSpec((2, t_cl, cl_lanes), _map3(nb_cl)),
                pl.BlockSpec((2, t_cl, cl_lanes), _map3(nb_cl)),
                pl.BlockSpec((2, t_cc, cc_lanes), _map3(nb_cc)),
                pl.BlockSpec((2, t_cc, cc_lanes), _map3(nb_cc)),
            ],
            out_specs=pl.BlockSpec((1, 8, 128), lambda c, i: (c, 0, 0)),
            scratch_shapes=[pltpu.VMEM((7, 8, 128), jnp.float32)],
        ),
        compiler_params=pltpu.CompilerParams(
            dimension_semantics=("parallel", "arbitrary"),
            vmem_limit_bytes=vmem_limit),
        cost_estimate=cost,
    )(Alogits, mask, cl1, cl2, cc1, cc2)

    parts = out[:, 0, :4]
    tot = parts[0] + parts[1]          # combine the two core-slices (linear)
    return tot[0], tot[1], tot[2], tot[3]


# ------------------------------ reference & test -----------------------------

def _reference(Alogits, mask, CL_1, CL_2, CC_1, CC_2,
               A=1.0, CL=1.0, CC=1.0, CC_type='l1',
               contrastive=False, cllambda=0.5):
    log_sm = jax.nn.log_softmax(Alogits.astype(jnp.float32), axis=1)
    aloss = jnp.mean(jnp.sum(-log_sm * mask, axis=1))
    mse = lambda a, b: jnp.mean((a - b) ** 2)
    l1 = lambda a, b: jnp.mean(jnp.abs(a - b))
    cos = lambda a, b: jnp.mean(jnp.einsum('nc,nc->n', a, b))
    cl1 = mse(CL_1[0], CL_1[1])
    cl2 = mse(CL_2[0], CL_2[1])
    if contrastive:
        cl1 = cl1 - cllambda * mse(CL_1[0], CL_2[1])
        cl2 = cl2 - cllambda * mse(CL_2[0], CL_1[1])
    cl_loss = 0.5 * (cl1 + cl2)
    dis = {'l1': l1, 'l2': mse, 'cos': cos}[CC_type]
    cc_dis = 0.5 * (dis(CC_1[0], CC_1[1]) + dis(CC_2[0], CC_2[1]))
    aloss, cl_loss, cc_dis = A * aloss, CL * cl_loss, CC * cc_dis
    return aloss + cl_loss + cc_dis, aloss, cl_loss, cc_dis


def _make_inputs(key, N, C, D):
    k = jax.random.split(key, 6)
    Alogits = jax.random.normal(k[0], (N, C), dtype=jnp.float32)
    mask = (jax.random.uniform(k[1], (N, C)) < 0.25).astype(jnp.float32)
    CL_1 = jax.random.normal(k[2], (2, N, D), dtype=jnp.float32)
    CL_2 = jax.random.normal(k[3], (2, N, D), dtype=jnp.float32)
    CC_1 = jax.random.normal(k[4], (2, N, D), dtype=jnp.float32)
    CC_2 = jax.random.normal(k[5], (2, N, D), dtype=jnp.float32)
    return Alogits, mask, CL_1, CL_2, CC_1, CC_2


if __name__ == "__main__":
    key = jax.random.PRNGKey(0)
    k_a, k_b = jax.random.split(key)

    # Packed (lane-dense) layout: N*D is a multiple of 128; N is deliberately
    # not a multiple of the row tile, exercising tail masking.
    inputs_a = _make_inputs(k_a, N=20, C=32, D=32)
    # Fallback row layout: N*D % 128 != 0.
    inputs_b = _make_inputs(k_b, N=6, C=16, D=24)

    cases = [
        (inputs_a, dict(A=1.0, CL=1.0, CC=1.0, CC_type='l1',
                        contrastive=False, cllambda=0.5)),
        (inputs_a, dict(A=1.0, CL=1.0, CC=1.0, CC_type='cos',
                        contrastive=True, cllambda=0.25)),
        (inputs_b, dict(A=0.7, CL=1.3, CC=0.9, CC_type='l2',
                        contrastive=True, cllambda=0.5)),
    ]
    for args, cfg in cases:
        got = cep_loss(*args, **cfg)
        jax.block_until_ready(got)
        ref = _reference(*args, **cfg)
        for g, r in zip(got, ref):
            assert jnp.allclose(g, r, atol=2e-5, rtol=2e-4), (cfg, g, r)

    print("KERNEL_OK")
</pallas_src>

<mosaic_0001>
module attributes {stable_mosaic.version = 11 : i64} {
  func.func @_loss_kernel(%arg0: i32, %arg1: i32, %arg2: memref<16x32xf32, #tpu.memory_space<vmem>>, %arg3: memref<16x32xf32, #tpu.memory_space<vmem>>, %arg4: memref<2x5x128xf32, #tpu.memory_space<vmem>>, %arg5: memref<2x5x128xf32, #tpu.memory_space<vmem>>, %arg6: memref<2x5x128xf32, #tpu.memory_space<vmem>>, %arg7: memref<2x5x128xf32, #tpu.memory_space<vmem>>, %arg8: memref<1x8x128xf32, #tpu.memory_space<vmem>>, %arg9: memref<7x8x128xf32, #tpu.memory_space<vmem>>) attributes {dimension_semantics = [#tpu.dimension_semantics<parallel>, #tpu.dimension_semantics<arbitrary>], iteration_bounds = array<i64: 2, 1>, scalar_prefetch = 0 : i64, scratch_operands = 1 : i64, tpu.core_type = #tpu.core_type<tc>, window_params = [{transform_indices = @transform_0, window_bounds = array<i64: 16, 32>}, {transform_indices = @transform_1, window_bounds = array<i64: 16, 32>}, {transform_indices = @transform_2, window_bounds = array<i64: 2, 5, 128>}, {transform_indices = @transform_3, window_bounds = array<i64: 2, 5, 128>}, {transform_indices = @transform_4, window_bounds = array<i64: 2, 5, 128>}, {transform_indices = @transform_5, window_bounds = array<i64: 2, 5, 128>}, {transform_indices = @transform_6, window_bounds = array<i64: 1, 8, 128>}]} {
    %c1_i32 = arith.constant 1 : i32
    %0 = arith.muli %arg0, %c1_i32 : i32
    %1 = arith.addi %0, %arg1 : i32
    %c0_i32 = arith.constant 0 : i32
    %2 = arith.cmpi eq, %arg1, %c0_i32 : i32
    %3 = arith.extui %2 : i1 to i32
    %c0_i32_0 = arith.constant 0 : i32
    %4 = arith.cmpi ne, %3, %c0_i32_0 : i32
    scf.if %4 {
      %cst = arith.constant 0.000000e+00 : f32
      %24 = vector.broadcast %cst : f32 to vector<7x8x128xf32>
      %c0 = arith.constant 0 : index
      %c0_11 = arith.constant 0 : index
      %c0_12 = arith.constant 0 : index
      %25 = vector.load %arg9[%c0, %c0_11, %c0_12] : memref<7x8x128xf32, #tpu.memory_space<vmem>>, vector<7x8x128xf32>
      tpu.vector_store %arg9[%c0, %c0_11, %c0_12], %24 {strides = array<i32>} : memref<7x8x128xf32, #tpu.memory_space<vmem>>, vector<7x8x128xf32>,
    } else {
    }
    %c1_i32_1 = arith.constant 1 : i32
    %5 = arith.addi %1, %c1_i32_1 : i32
    %c16_i32 = arith.constant 16 : i32
    %6 = arith.muli %5, %c16_i32 : i32
    %c20_i32 = arith.constant 20 : i32
    %7 = arith.cmpi sgt, %6, %c20_i32 : i32
    %c1_i32_2 = arith.constant 1 : i32
    %8 = arith.addi %1, %c1_i32_2 : i32
    %c5_i32 = arith.constant 5 : i32
    %9 = arith.muli %8, %c5_i32 : i32
    %c5_i32_3 = arith.constant 5 : i32
    %10 = arith.cmpi sgt, %9, %c5_i32_3 : i32
    %c1_i32_4 = arith.constant 1 : i32
    %11 = arith.addi %1, %c1_i32_4 : i32
    %c5_i32_5 = arith.constant 5 : i32
    %12 = arith.muli %11, %c5_i32_5 : i32
    %c5_i32_6 = arith.constant 5 : i32
    %13 = arith.cmpi sgt, %12, %c5_i32_6 : i32
    %14 = arith.ori %7, %10 : i1
    %15 = arith.ori %14, %13 : i1
    %16 = arith.extui %15 : i1 to i32
    %c0_i32_7 = arith.constant 0 : i32
    %17 = arith.cmpi ne, %16, %c0_i32_7 : i32
    scf.if %17 {
      %c0 = arith.constant 0 : index
      %c0_11 = arith.constant 0 : index
      %24 = vector.load %arg2[%c0, %c0_11] : memref<16x32xf32, #tpu.memory_space<vmem>>, vector<16x32xf32>
      %c0_12 = arith.constant 0 : index
      %c0_13 = arith.constant 0 : index
      %25 = vector.load %arg3[%c0_12, %c0_13] : memref<16x32xf32, #tpu.memory_space<vmem>>, vector<16x32xf32>
      %cst = arith.constant dense<0xFF800000> : vector<16xf32>
      %26 = vector.multi_reduction <maximumf>, %24, %cst [1] : vector<16x32xf32> to vector<16xf32>
      %27 = vector.shape_cast %26 : vector<16xf32> to vector<16x1xf32>
      %28 = vector.broadcast %27 : vector<16x1xf32> to vector<16x32xf32>
      %29 = arith.subf %24, %28 : vector<16x32xf32>
      %30 = math.exp %29 : vector<16x32xf32>
      %cst_14 = arith.constant dense<0.000000e+00> : vector<16xf32>
      %31 = vector.multi_reduction <add>, %30, %cst_14 [1] : vector<16x32xf32> to vector<16xf32>
      %32 = vector.shape_cast %31 : vector<16xf32> to vector<16x1xf32>
      %33 = math.log %32 : vector<16x1xf32>
      %cst_15 = arith.constant dense<0.000000e+00> : vector<16xf32>
      %34 = vector.multi_reduction <add>, %25, %cst_15 [1] : vector<16x32xf32> to vector<16xf32>
      %35 = vector.shape_cast %34 : vector<16xf32> to vector<16x1xf32>
      %36 = arith.addf %27, %33 : vector<16x1xf32>
      %37 = arith.mulf %35, %36 : vector<16x1xf32>
      %38 = arith.mulf %25, %24 : vector<16x32xf32>
      %cst_16 = arith.constant dense<0.000000e+00> : vector<16xf32>
      %39 = vector.multi_reduction <add>, %38, %cst_16 [1] : vector<16x32xf32> to vector<16xf32>
      %40 = vector.shape_cast %39 : vector<16xf32> to vector<16x1xf32>
      %41 = arith.subf %37, %40 : vector<16x1xf32>
      %42 = tpu.iota {dimensions = array<i32: 0>} : vector<16x1xi32>
      %c16_i32_17 = arith.constant 16 : i32
      %43 = arith.muli %1, %c16_i32_17 : i32
      %44 = vector.broadcast %43 : i32 to vector<16x1xi32>
      %45 = arith.addi %42, %44 : vector<16x1xi32>
      %c20_i32_18 = arith.constant 20 : i32
      %46 = vector.broadcast %c20_i32_18 : i32 to vector<16x1xi32>
      %47 = arith.cmpi slt, %45, %46 : vector<16x1xi32>
      %cst_19 = arith.constant 0.000000e+00 : f32
      %48 = vector.broadcast %cst_19 : f32 to vector<16x1xf32>
      %49 = arith.select %47, %41, %48 : vector<16x1xi1>, vector<16x1xf32>
      %50 = vector.shape_cast %49 : vector<16x1xf32> to vector<2x8x1xf32>
      %cst_20 = arith.constant dense<0.000000e+00> : vector<8x1xf32>
      %51 = vector.multi_reduction <add>, %50, %cst_20 [0] : vector<2x8x1xf32> to vector<8x1xf32>
      %c0_21 = arith.constant 0 : index
      %c0_22 = arith.constant 0 : index
      %c0_23 = arith.constant 0 : index
      %52 = vector.load %arg9[%c0_21, %c0_22, %c0_23] : memref<7x8x128xf32, #tpu.memory_space<vmem>>, vector<1x8x1xf32>
      %53 = vector.shape_cast %52 : vector<1x8x1xf32> to vector<8x1xf32>
      %54 = arith.addf %53, %51 : vector<8x1xf32>
      %c0_24 = arith.constant 0 : index
      %c0_25 = arith.constant 0 : index
      %c0_26 = arith.constant 0 : index
      %55 = vector.load %arg9[%c0_24, %c0_25, %c0_26] : memref<7x8x128xf32, #tpu.memory_space<vmem>>, vector<1x8x1xf32>
      %56 = vector.shape_cast %55 : vector<1x8x1xf32> to vector<8x1xf32>
      %57 = vector.shape_cast %54 : vector<8x1xf32> to vector<1x8x1xf32>
      tpu.vector_store %arg9[%c0_24, %c0_25, %c0_26], %57 {strides = array<i32>} : memref<7x8x128xf32, #tpu.memory_space<vmem>>, vector<1x8x1xf32>,
      %58 = tpu.iota {dimensions = array<i32: 0>} : vector<5x1xi32>
      %c5_i32_27 = arith.constant 5 : i32
      %59 = arith.muli %1, %c5_i32_27 : i32
      %60 = vector.broadcast %59 : i32 to vector<5x1xi32>
      %61 = arith.addi %58, %60 : vector<5x1xi32>
      %c5_i32_28 = arith.constant 5 : i32
      %62 = vector.broadcast %c5_i32_28 : i32 to vector<5x1xi32>
      %63 = arith.cmpi slt, %61, %62 : vector<5x1xi32>
      %64 = tpu.iota {dimensions = array<i32: 0>} : vector<5x1xi32>
      %c5_i32_29 = arith.constant 5 : i32
      %65 = arith.muli %1, %c5_i32_29 : i32
      %66 = vector.broadcast %65 : i32 to vector<5x1xi32>
      %67 = arith.addi %64, %66 : vector<5x1xi32>
      %c5_i32_30 = arith.constant 5 : i32
      %68 = vector.broadcast %c5_i32_30 : i32 to vector<5x1xi32>
      %69 = arith.cmpi slt, %67, %68 : vector<5x1xi32>
      %c0_31 = arith.constant 0 : index
      %c0_32 = arith.constant 0 : index
      %c0_33 = arith.constant 0 : index
      %70 = vector.load %arg4[%c0_31, %c0_32, %c0_33] : memref<2x5x128xf32, #tpu.memory_space<vmem>>, vector<1x5x128xf32>
      %71 = vector.shape_cast %70 : vector<1x5x128xf32> to vector<5x128xf32>
      %c1 = arith.constant 1 : index
      %c0_34 = arith.constant 0 : index
      %c0_35 = arith.constant 0 : index
      %72 = vector.load %arg4[%c1, %c0_34, %c0_35] : memref<2x5x128xf32, #tpu.memory_space<vmem>>, vector<1x5x128xf32>
      %73 = vector.shape_cast %72 : vector<1x5x128xf32> to vector<5x128xf32>
      %c0_36 = arith.constant 0 : index
      %c0_37 = arith.constant 0 : index
      %c0_38 = arith.constant 0 : index
      %74 = vector.load %arg5[%c0_36, %c0_37, %c0_38] : memref<2x5x128xf32, #tpu.memory_space<vmem>>, vector<1x5x128xf32>
      %75 = vector.shape_cast %74 : vector<1x5x128xf32> to vector<5x128xf32>
      %c1_39 = arith.constant 1 : index
      %c0_40 = arith.constant 0 : index
      %c0_41 = arith.constant 0 : index
      %76 = vector.load %arg5[%c1_39, %c0_40, %c0_41] : memref<2x5x128xf32, #tpu.memory_space<vmem>>, vector<1x5x128xf32>
      %77 = vector.shape_cast %76 : vector<1x5x128xf32> to vector<5x128xf32>
      %78 = arith.subf %71, %73 : vector<5x128xf32>
      %cst_42 = arith.constant 0.000000e+00 : f32
      %79 = vector.shape_cast %63 : vector<5x1xi1> to vector<5x1xi1>
      %80 = vector.broadcast %79 : vector<5x1xi1> to vector<5x128xi1>
      %81 = vector.broadcast %cst_42 : f32 to vector<5x128xf32>
      %82 = arith.select %80, %78, %81 : vector<5x128xi1>, vector<5x128xf32>
      %83 = arith.mulf %82, %82 : vector<5x128xf32>
      %c1_43 = arith.constant 1 : index
      %c0_44 = arith.constant 0 : index
      %c0_45 = arith.constant 0 : index
      %84 = vector.load %arg9[%c1_43, %c0_44, %c0_45] : memref<7x8x128xf32, #tpu.memory_space<vmem>>, vector<1x5x128xf32>
      %85 = vector.shape_cast %84 : vector<1x5x128xf32> to vector<5x128xf32>
      %86 = arith.addf %85, %83 : vector<5x128xf32>
      %c1_46 = arith.constant 1 : index
      %c0_47 = arith.constant 0 : index
      %c0_48 = arith.constant 0 : index
      %87 = vector.load %arg9[%c1_46, %c0_47, %c0_48] : memref<7x8x128xf32, #tpu.memory_space<vmem>>, vector<1x5x128xf32>
      %88 = vector.shape_cast %87 : vector<1x5x128xf32> to vector<5x128xf32>
      %89 = vector.shape_cast %86 : vector<5x128xf32> to vector<1x5x128xf32>
      tpu.vector_store %arg9[%c1_46, %c0_47, %c0_48], %89 {strides = array<i32>} : memref<7x8x128xf32, #tpu.memory_space<vmem>>, vector<1x5x128xf32>,
      %90 = arith.subf %75, %77 : vector<5x128xf32>
      %cst_49 = arith.constant 0.000000e+00 : f32
      %91 = vector.shape_cast %63 : vector<5x1xi1> to vector<5x1xi1>
      %92 = vector.broadcast %91 : vector<5x1xi1> to vector<5x128xi1>
      %93 = vector.broadcast %cst_49 : f32 to vector<5x128xf32>
      %94 = arith.select %92, %90, %93 : vector<5x128xi1>, vector<5x128xf32>
      %95 = arith.mulf %94, %94 : vector<5x128xf32>
      %c2 = arith.constant 2 : index
      %c0_50 = arith.constant 0 : index
      %c0_51 = arith.constant 0 : index
      %96 = vector.load %arg9[%c2, %c0_50, %c0_51] : memref<7x8x128xf32, #tpu.memory_space<vmem>>, vector<1x5x128xf32>
      %97 = vector.shape_cast %96 : vector<1x5x128xf32> to vector<5x128xf32>
      %98 = arith.addf %97, %95 : vector<5x128xf32>
      %c2_52 = arith.constant 2 : index
      %c0_53 = arith.constant 0 : index
      %c0_54 = arith.constant 0 : index
      %99 = vector.load %arg9[%c2_52, %c0_53, %c0_54] : memref<7x8x128xf32, #tpu.memory_space<vmem>>, vector<1x5x128xf32>
      %100 = vector.shape_cast %99 : vector<1x5x128xf32> to vector<5x128xf32>
      %101 = vector.shape_cast %98 : vector<5x128xf32> to vector<1x5x128xf32>
      tpu.vector_store %arg9[%c2_52, %c0_53, %c0_54], %101 {strides = array<i32>} : memref<7x8x128xf32, #tpu.memory_space<vmem>>, vector<1x5x128xf32>,
      %c0_55 = arith.constant 0 : index
      %c0_56 = arith.constant 0 : index
      %c0_57 = arith.constant 0 : index
      %102 = vector.load %arg6[%c0_55, %c0_56, %c0_57] : memref<2x5x128xf32, #tpu.memory_space<vmem>>, vector<1x5x128xf32>
      %103 = vector.shape_cast %102 : vector<1x5x128xf32> to vector<5x128xf32>
      %c1_58 = arith.constant 1 : index
      %c0_59 = arith.constant 0 : index
      %c0_60 = arith.constant 0 : index
      %104 = vector.load %arg6[%c1_58, %c0_59, %c0_60] : memref<2x5x128xf32, #tpu.memory_space<vmem>>, vector<1x5x128xf32>
      %105 = vector.shape_cast %104 : vector<1x5x128xf32> to vector<5x128xf32>
      %c0_61 = arith.constant 0 : index
      %c0_62 = arith.constant 0 : index
      %c0_63 = arith.constant 0 : index
      %106 = vector.load %arg7[%c0_61, %c0_62, %c0_63] : memref<2x5x128xf32, #tpu.memory_space<vmem>>, vector<1x5x128xf32>
      %107 = vector.shape_cast %106 : vector<1x5x128xf32> to vector<5x128xf32>
      %c1_64 = arith.constant 1 : index
      %c0_65 = arith.constant 0 : index
      %c0_66 = arith.constant 0 : index
      %108 = vector.load %arg7[%c1_64, %c0_65, %c0_66] : memref<2x5x128xf32, #tpu.memory_space<vmem>>, vector<1x5x128xf32>
      %109 = vector.shape_cast %108 : vector<1x5x128xf32> to vector<5x128xf32>
      %110 = arith.subf %103, %105 : vector<5x128xf32>
      %111 = math.absf %110 : vector<5x128xf32>
      %cst_67 = arith.constant 0.000000e+00 : f32
      %112 = vector.shape_cast %69 : vector<5x1xi1> to vector<5x1xi1>
      %113 = vector.broadcast %112 : vector<5x1xi1> to vector<5x128xi1>
      %114 = vector.broadcast %cst_67 : f32 to vector<5x128xf32>
      %115 = arith.select %113, %111, %114 : vector<5x128xi1>, vector<5x128xf32>
      %c5 = arith.constant 5 : index
      %c0_68 = arith.constant 0 : index
      %c0_69 = arith.constant 0 : index
      %116 = vector.load %arg9[%c5, %c0_68, %c0_69] : memref<7x8x128xf32, #tpu.memory_space<vmem>>, vector<1x5x128xf32>
      %117 = vector.shape_cast %116 : vector<1x5x128xf32> to vector<5x128xf32>
      %118 = arith.addf %117, %115 : vector<5x128xf32>
      %c5_70 = arith.constant 5 : index
      %c0_71 = arith.constant 0 : index
      %c0_72 = arith.constant 0 : index
      %119 = vector.load %arg9[%c5_70, %c0_71, %c0_72] : memref<7x8x128xf32, #tpu.memory_space<vmem>>, vector<1x5x128xf32>
      %120 = vector.shape_cast %119 : vector<1x5x128xf32> to vector<5x128xf32>
      %121 = vector.shape_cast %118 : vector<5x128xf32> to vector<1x5x128xf32>
      tpu.vector_store %arg9[%c5_70, %c0_71, %c0_72], %121 {strides = array<i32>} : memref<7x8x128xf32, #tpu.memory_space<vmem>>, vector<1x5x128xf32>,
      %122 = arith.subf %107, %109 : vector<5x128xf32>
      %123 = math.absf %122 : vector<5x128xf32>
      %cst_73 = arith.constant 0.000000e+00 : f32
      %124 = vector.shape_cast %69 : vector<5x1xi1> to vector<5x1xi1>
      %125 = vector.broadcast %124 : vector<5x1xi1> to vector<5x128xi1>
      %126 = vector.broadcast %cst_73 : f32 to vector<5x128xf32>
      %127 = arith.select %125, %123, %126 : vector<5x128xi1>, vector<5x128xf32>
      %c6 = arith.constant 6 : index
      %c0_74 = arith.constant 0 : index
      %c0_75 = arith.constant 0 : index
      %128 = vector.load %arg9[%c6, %c0_74, %c0_75] : memref<7x8x128xf32, #tpu.memory_space<vmem>>, vector<1x5x128xf32>
      %129 = vector.shape_cast %128 : vector<1x5x128xf32> to vector<5x128xf32>
      %130 = arith.addf %129, %127 : vector<5x128xf32>
      %c6_76 = arith.constant 6 : index
      %c0_77 = arith.constant 0 : index
      %c0_78 = arith.constant 0 : index
      %131 = vector.load %arg9[%c6_76, %c0_77, %c0_78] : memref<7x8x128xf32, #tpu.memory_space<vmem>>, vector<1x5x128xf32>
      %132 = vector.shape_cast %131 : vector<1x5x128xf32> to vector<5x128xf32>
      %133 = vector.shape_cast %130 : vector<5x128xf32> to vector<1x5x128xf32>
      tpu.vector_store %arg9[%c6_76, %c0_77, %c0_78], %133 {strides = array<i32>} : memref<7x8x128xf32, #tpu.memory_space<vmem>>, vector<1x5x128xf32>,
    } else {
    }
    %true = arith.constant true
    %18 = arith.xori %15, %true : i1
    %19 = arith.extui %18 : i1 to i32
    %c0_i32_8 = arith.constant 0 : i32
    %20 = arith.cmpi ne, %19, %c0_i32_8 : i32
    scf.if %20 {
      %c0 = arith.constant 0 : index
      %c0_11 = arith.constant 0 : index
      %24 = vector.load %arg2[%c0, %c0_11] : memref<16x32xf32, #tpu.memory_space<vmem>>, vector<16x32xf32>
      %c0_12 = arith.constant 0 : index
      %c0_13 = arith.constant 0 : index
      %25 = vector.load %arg3[%c0_12, %c0_13] : memref<16x32xf32, #tpu.memory_space<vmem>>, vector<16x32xf32>
      %cst = arith.constant dense<0xFF800000> : vector<16xf32>
      %26 = vector.multi_reduction <maximumf>, %24, %cst [1] : vector<16x32xf32> to vector<16xf32>
      %27 = vector.shape_cast %26 : vector<16xf32> to vector<16x1xf32>
      %28 = vector.broadcast %27 : vector<16x1xf32> to vector<16x32xf32>
      %29 = arith.subf %24, %28 : vector<16x32xf32>
      %30 = math.exp %29 : vector<16x32xf32>
      %cst_14 = arith.constant dense<0.000000e+00> : vector<16xf32>
      %31 = vector.multi_reduction <add>, %30, %cst_14 [1] : vector<16x32xf32> to vector<16xf32>
      %32 = vector.shape_cast %31 : vector<16xf32> to vector<16x1xf32>
      %33 = math.log %32 : vector<16x1xf32>
      %cst_15 = arith.constant dense<0.000000e+00> : vector<16xf32>
      %34 = vector.multi_reduction <add>, %25, %cst_15 [1] : vector<16x32xf32> to vector<16xf32>
      %35 = vector.shape_cast %34 : vector<16xf32> to vector<16x1xf32>
      %36 = arith.addf %27, %33 : vector<16x1xf32>
      %37 = arith.mulf %35, %36 : vector<16x1xf32>
      %38 = arith.mulf %25, %24 : vector<16x32xf32>
      %cst_16 = arith.constant dense<0.000000e+00> : vector<16xf32>
      %39 = vector.multi_reduction <add>, %38, %cst_16 [1] : vector<16x32xf32> to vector<16xf32>
      %40 = vector.shape_cast %39 : vector<16xf32> to vector<16x1xf32>
      %41 = arith.subf %37, %40 : vector<16x1xf32>
      %42 = vector.shape_cast %41 : vector<16x1xf32> to vector<2x8x1xf32>
      %cst_17 = arith.constant dense<0.000000e+00> : vector<8x1xf32>
      %43 = vector.multi_reduction <add>, %42, %cst_17 [0] : vector<2x8x1xf32> to vector<8x1xf32>
      %c0_18 = arith.constant 0 : index
      %c0_19 = arith.constant 0 : index
      %c0_20 = arith.constant 0 : index
      %44 = vector.load %arg9[%c0_18, %c0_19, %c0_20] : memref<7x8x128xf32, #tpu.memory_space<vmem>>, vector<1x8x1xf32>
      %45 = vector.shape_cast %44 : vector<1x8x1xf32> to vector<8x1xf32>
      %46 = arith.addf %45, %43 : vector<8x1xf32>
      %c0_21 = arith.constant 0 : index
      %c0_22 = arith.constant 0 : index
      %c0_23 = arith.constant 0 : index
      %47 = vector.load %arg9[%c0_21, %c0_22, %c0_23] : memref<7x8x128xf32, #tpu.memory_space<vmem>>, vector<1x8x1xf32>
      %48 = vector.shape_cast %47 : vector<1x8x1xf32> to vector<8x1xf32>
      %49 = vector.shape_cast %46 : vector<8x1xf32> to vector<1x8x1xf32>
      tpu.vector_store %arg9[%c0_21, %c0_22, %c0_23], %49 {strides = array<i32>} : memref<7x8x128xf32, #tpu.memory_space<vmem>>, vector<1x8x1xf32>,
      %c0_24 = arith.constant 0 : index
      %c0_25 = arith.constant 0 : index
      %c0_26 = arith.constant 0 : index
      %50 = vector.load %arg4[%c0_24, %c0_25, %c0_26] : memref<2x5x128xf32, #tpu.memory_space<vmem>>, vector<1x5x128xf32>
      %51 = vector.shape_cast %50 : vector<1x5x128xf32> to vector<5x128xf32>
      %c1 = arith.constant 1 : index
      %c0_27 = arith.constant 0 : index
      %c0_28 = arith.constant 0 : index
      %52 = vector.load %arg4[%c1, %c0_27, %c0_28] : memref<2x5x128xf32, #tpu.memory_space<vmem>>, vector<1x5x128xf32>
      %53 = vector.shape_cast %52 : vector<1x5x128xf32> to vector<5x128xf32>
      %c0_29 = arith.constant 0 : index
      %c0_30 = arith.constant 0 : index
      %c0_31 = arith.constant 0 : index
      %54 = vector.load %arg5[%c0_29, %c0_30, %c0_31] : memref<2x5x128xf32, #tpu.memory_space<vmem>>, vector<1x5x128xf32>
      %55 = vector.shape_cast %54 : vector<1x5x128xf32> to vector<5x128xf32>
      %c1_32 = arith.constant 1 : index
      %c0_33 = arith.constant 0 : index
      %c0_34 = arith.constant 0 : index
      %56 = vector.load %arg5[%c1_32, %c0_33, %c0_34] : memref<2x5x128xf32, #tpu.memory_space<vmem>>, vector<1x5x128xf32>
      %57 = vector.shape_cast %56 : vector<1x5x128xf32> to vector<5x128xf32>
      %58 = arith.subf %51, %53 : vector<5x128xf32>
      %59 = arith.mulf %58, %58 : vector<5x128xf32>
      %c1_35 = arith.constant 1 : index
      %c0_36 = arith.constant 0 : index
      %c0_37 = arith.constant 0 : index
      %60 = vector.load %arg9[%c1_35, %c0_36, %c0_37] : memref<7x8x128xf32, #tpu.memory_space<vmem>>, vector<1x5x128xf32>
      %61 = vector.shape_cast %60 : vector<1x5x128xf32> to vector<5x128xf32>
      %62 = arith.addf %61, %59 : vector<5x128xf32>
      %c1_38 = arith.constant 1 : index
      %c0_39 = arith.constant 0 : index
      %c0_40 = arith.constant 0 : index
      %63 = vector.load %arg9[%c1_38, %c0_39, %c0_40] : memref<7x8x128xf32, #tpu.memory_space<vmem>>, vector<1x5x128xf32>
      %64 = vector.shape_cast %63 : vector<1x5x128xf32> to vector<5x128xf32>
      %65 = vector.shape_cast %62 : vector<5x128xf32> to vector<1x5x128xf32>
      tpu.vector_store %arg9[%c1_38, %c0_39, %c0_40], %65 {strides = array<i32>} : memref<7x8x128xf32, #tpu.memory_space<vmem>>, vector<1x5x128xf32>,
      %66 = arith.subf %55, %57 : vector<5x128xf32>
      %67 = arith.mulf %66, %66 : vector<5x128xf32>
      %c2 = arith.constant 2 : index
      %c0_41 = arith.constant 0 : index
      %c0_42 = arith.constant 0 : index
      %68 = vector.load %arg9[%c2, %c0_41, %c0_42] : memref<7x8x128xf32, #tpu.memory_space<vmem>>, vector<1x5x128xf32>
      %69 = vector.shape_cast %68 : vector<1x5x128xf32> to vector<5x128xf32>
      %70 = arith.addf %69, %67 : vector<5x128xf32>
      %c2_43 = arith.constant 2 : index
      %c0_44 = arith.constant 0 : index
      %c0_45 = arith.constant 0 : index
      %71 = vector.load %arg9[%c2_43, %c0_44, %c0_45] : memref<7x8x128xf32, #tpu.memory_space<vmem>>, vector<1x5x128xf32>
      %72 = vector.shape_cast %71 : vector<1x5x128xf32> to vector<5x128xf32>
      %73 = vector.shape_cast %70 : vector<5x128xf32> to vector<1x5x128xf32>
      tpu.vector_store %arg9[%c2_43, %c0_44, %c0_45], %73 {strides = array<i32>} : memref<7x8x128xf32, #tpu.memory_space<vmem>>, vector<1x5x128xf32>,
      %c0_46 = arith.constant 0 : index
      %c0_47 = arith.constant 0 : index
      %c0_48 = arith.constant 0 : index
      %74 = vector.load %arg6[%c0_46, %c0_47, %c0_48] : memref<2x5x128xf32, #tpu.memory_space<vmem>>, vector<1x5x128xf32>
      %75 = vector.shape_cast %74 : vector<1x5x128xf32> to vector<5x128xf32>
      %c1_49 = arith.constant 1 : index
      %c0_50 = arith.constant 0 : index
      %c0_51 = arith.constant 0 : index
      %76 = vector.load %arg6[%c1_49, %c0_50, %c0_51] : memref<2x5x128xf32, #tpu.memory_space<vmem>>, vector<1x5x128xf32>
      %77 = vector.shape_cast %76 : vector<1x5x128xf32> to vector<5x128xf32>
      %c0_52 = arith.constant 0 : index
      %c0_53 = arith.constant 0 : index
      %c0_54 = arith.constant 0 : index
      %78 = vector.load %arg7[%c0_52, %c0_53, %c0_54] : memref<2x5x128xf32, #tpu.memory_space<vmem>>, vector<1x5x128xf32>
      %79 = vector.shape_cast %78 : vector<1x5x128xf32> to vector<5x128xf32>
      %c1_55 = arith.constant 1 : index
      %c0_56 = arith.constant 0 : index
      %c0_57 = arith.constant 0 : index
      %80 = vector.load %arg7[%c1_55, %c0_56, %c0_57] : memref<2x5x128xf32, #tpu.memory_space<vmem>>, vector<1x5x128xf32>
      %81 = vector.shape_cast %80 : vector<1x5x128xf32> to vector<5x128xf32>
      %82 = arith.subf %75, %77 : vector<5x128xf32>
      %83 = math.absf %82 : vector<5x128xf32>
      %c5 = arith.constant 5 : index
      %c0_58 = arith.constant 0 : index
      %c0_59 = arith.constant 0 : index
      %84 = vector.load %arg9[%c5, %c0_58, %c0_59] : memref<7x8x128xf32, #tpu.memory_space<vmem>>, vector<1x5x128xf32>
      %85 = vector.shape_cast %84 : vector<1x5x128xf32> to vector<5x128xf32>
      %86 = arith.addf %85, %83 : vector<5x128xf32>
      %c5_60 = arith.constant 5 : index
      %c0_61 = arith.constant 0 : index
      %c0_62 = arith.constant 0 : index
      %87 = vector.load %arg9[%c5_60, %c0_61, %c0_62] : memref<7x8x128xf32, #tpu.memory_space<vmem>>, vector<1x5x128xf32>
      %88 = vector.shape_cast %87 : vector<1x5x128xf32> to vector<5x128xf32>
      %89 = vector.shape_cast %86 : vector<5x128xf32> to vector<1x5x128xf32>
      tpu.vector_store %arg9[%c5_60, %c0_61, %c0_62], %89 {strides = array<i32>} : memref<7x8x128xf32, #tpu.memory_space<vmem>>, vector<1x5x128xf32>,
      %90 = arith.subf %79, %81 : vector<5x128xf32>
      %91 = math.absf %90 : vector<5x128xf32>
      %c6 = arith.constant 6 : index
      %c0_63 = arith.constant 0 : index
      %c0_64 = arith.constant 0 : index
      %92 = vector.load %arg9[%c6, %c0_63, %c0_64] : memref<7x8x128xf32, #tpu.memory_space<vmem>>, vector<1x5x128xf32>
      %93 = vector.shape_cast %92 : vector<1x5x128xf32> to vector<5x128xf32>
      %94 = arith.addf %93, %91 : vector<5x128xf32>
      %c6_65 = arith.constant 6 : index
      %c0_66 = arith.constant 0 : index
      %c0_67 = arith.constant 0 : index
      %95 = vector.load %arg9[%c6_65, %c0_66, %c0_67] : memref<7x8x128xf32, #tpu.memory_space<vmem>>, vector<1x5x128xf32>
      %96 = vector.shape_cast %95 : vector<1x5x128xf32> to vector<5x128xf32>
      %97 = vector.shape_cast %94 : vector<5x128xf32> to vector<1x5x128xf32>
      tpu.vector_store %arg9[%c6_65, %c0_66, %c0_67], %97 {strides = array<i32>} : memref<7x8x128xf32, #tpu.memory_space<vmem>>, vector<1x5x128xf32>,
    } else {
    }
    %c0_i32_9 = arith.constant 0 : i32
    %21 = arith.cmpi eq, %arg1, %c0_i32_9 : i32
    %22 = arith.extui %21 : i1 to i32
    %c0_i32_10 = arith.constant 0 : i32
    %23 = arith.cmpi ne, %22, %c0_i32_10 : i32
    scf.if %23 {
      %c0 = arith.constant 0 : index
      %c0_11 = arith.constant 0 : index
      %c0_12 = arith.constant 0 : index
      %24 = vector.load %arg9[%c0, %c0_11, %c0_12] : memref<7x8x128xf32, #tpu.memory_space<vmem>>, vector<1x8x128xf32>
      %25 = vector.shape_cast %24 : vector<1x8x128xf32> to vector<8x128xf32>
      %26 = vector.shape_cast %25 : vector<8x128xf32> to vector<1x8x128xf32>
      %cst = arith.constant dense<0.000000e+00> : vector<1xf32>
      %27 = vector.multi_reduction <add>, %26, %cst [1, 2] : vector<1x8x128xf32> to vector<1xf32>
      %28 = vector.shape_cast %27 : vector<1xf32> to vector<1x1x1xf32>
      %29 = vector.extract %28[0, 0, 0] : f32 from vector<1x1x1xf32>
      %cst_13 = arith.constant 2.000000e+01 : f32
      %30 = arith.divf %29, %cst_13 : f32
      %c1 = arith.constant 1 : index
      %c0_14 = arith.constant 0 : index
      %c0_15 = arith.constant 0 : index
      %31 = vector.load %arg9[%c1, %c0_14, %c0_15] : memref<7x8x128xf32, #tpu.memory_space<vmem>>, vector<1x8x128xf32>
      %32 = vector.shape_cast %31 : vector<1x8x128xf32> to vector<8x128xf32>
      %33 = vector.shape_cast %32 : vector<8x128xf32> to vector<1x8x128xf32>
      %cst_16 = arith.constant dense<0.000000e+00> : vector<1xf32>
      %34 = vector.multi_reduction <add>, %33, %cst_16 [1, 2] : vector<1x8x128xf32> to vector<1xf32>
      %35 = vector.shape_cast %34 : vector<1xf32> to vector<1x1x1xf32>
      %36 = vector.extract %35[0, 0, 0] : f32 from vector<1x1x1xf32>
      %cst_17 = arith.constant 6.400000e+02 : f32
      %37 = arith.divf %36, %cst_17 : f32
      %c2 = arith.constant 2 : index
      %c0_18 = arith.constant 0 : index
      %c0_19 = arith.constant 0 : index
      %38 = vector.load %arg9[%c2, %c0_18, %c0_19] : memref<7x8x128xf32, #tpu.memory_space<vmem>>, vector<1x8x128xf32>
      %39 = vector.shape_cast %38 : vector<1x8x128xf32> to vector<8x128xf32>
      %40 = vector.shape_cast %39 : vector<8x128xf32> to vector<1x8x128xf32>
      %cst_20 = arith.constant dense<0.000000e+00> : vector<1xf32>
      %41 = vector.multi_reduction <add>, %40, %cst_20 [1, 2] : vector<1x8x128xf32> to vector<1xf32>
      %42 = vector.shape_cast %41 : vector<1xf32> to vector<1x1x1xf32>
      %43 = vector.extract %42[0, 0, 0] : f32 from vector<1x1x1xf32>
      %cst_21 = arith.constant 6.400000e+02 : f32
      %44 = arith.divf %43, %cst_21 : f32
      %45 = arith.addf %37, %44 : f32
      %cst_22 = arith.constant 5.000000e-01 : f32
      %46 = arith.mulf %cst_22, %45 : f32
      %c5 = arith.constant 5 : index
      %c0_23 = arith.constant 0 : index
      %c0_24 = arith.constant 0 : index
      %47 = vector.load %arg9[%c5, %c0_23, %c0_24] : memref<7x8x128xf32, #tpu.memory_space<vmem>>, vector<1x8x128xf32>
      %48 = vector.shape_cast %47 : vector<1x8x128xf32> to vector<8x128xf32>
      %49 = vector.shape_cast %48 : vector<8x128xf32> to vector<1x8x128xf32>
      %cst_25 = arith.constant dense<0.000000e+00> : vector<1xf32>
      %50 = vector.multi_reduction <add>, %49, %cst_25 [1, 2] : vector<1x8x128xf32> to vector<1xf32>
      %51 = vector.shape_cast %50 : vector<1xf32> to vector<1x1x1xf32>
      %52 = vector.extract %51[0, 0, 0] : f32 from vector<1x1x1xf32>
      %c6 = arith.constant 6 : index
      %c0_26 = arith.constant 0 : index
      %c0_27 = arith.constant 0 : index
      %53 = vector.load %arg9[%c6, %c0_26, %c0_27] : memref<7x8x128xf32, #tpu.memory_space<vmem>>, vector<1x8x128xf32>
      %54 = vector.shape_cast %53 : vector<1x8x128xf32> to vector<8x128xf32>
      %55 = vector.shape_cast %54 : vector<8x128xf32> to vector<1x8x128xf32>
      %cst_28 = arith.constant dense<0.000000e+00> : vector<1xf32>
      %56 = vector.multi_reduction <add>, %55, %cst_28 [1, 2] : vector<1x8x128xf32> to vector<1xf32>
      %57 = vector.shape_cast %56 : vector<1xf32> to vector<1x1x1xf32>
      %58 = vector.extract %57[0, 0, 0] : f32 from vector<1x1x1xf32>
      %59 = arith.addf %52, %58 : f32
      %cst_29 = arith.constant 5.000000e-01 : f32
      %60 = arith.mulf %cst_29, %59 : f32
      %cst_30 = arith.constant 6.400000e+02 : f32
      %61 = arith.divf %60, %cst_30 : f32
      %cst_31 = arith.constant 1.000000e+00 : f32
      %62 = arith.mulf %cst_31, %30 : f32
      %cst_32 = arith.constant 1.000000e+00 : f32
      %63 = arith.mulf %cst_32, %46 : f32
      %cst_33 = arith.constant 1.000000e+00 : f32
      %64 = arith.mulf %cst_33, %61 : f32
      %65 = arith.addf %62, %63 : f32
      %66 = arith.addf %65, %64 : f32
      %67 = tpu.iota {dimensions = array<i32: 1>} : vector<8x128xi32>
      %c0_i32_34 = arith.constant 0 : i32
      %68 = vector.broadcast %c0_i32_34 : i32 to vector<8x128xi32>
      %69 = arith.cmpi eq, %67, %68 : vector<8x128xi32>
      %cst_35 = arith.constant 0.000000e+00 : f32
      %70 = vector.broadcast %66 : f32 to vector<8x128xf32>
      %71 = vector.broadcast %cst_35 : f32 to vector<8x128xf32>
      %72 = arith.select %69, %70, %71 : vector<8x128xi1>, vector<8x128xf32>
      %c1_i32_36 = arith.constant 1 : i32
      %73 = vector.broadcast %c1_i32_36 : i32 to vector<8x128xi32>
      %74 = arith.cmpi eq, %67, %73 : vector<8x128xi32>
      %cst_37 = arith.constant 0.000000e+00 : f32
      %75 = vector.broadcast %62 : f32 to vector<8x128xf32>
      %76 = vector.broadcast %cst_37 : f32 to vector<8x128xf32>
      %77 = arith.select %74, %75, %76 : vector<8x128xi1>, vector<8x128xf32>
      %78 = arith.addf %72, %77 : vector<8x128xf32>
      %c2_i32 = arith.constant 2 : i32
      %79 = vector.broadcast %c2_i32 : i32 to vector<8x128xi32>
      %80 = arith.cmpi eq, %67, %79 : vector<8x128xi32>
      %cst_38 = arith.constant 0.000000e+00 : f32
      %81 = vector.broadcast %63 : f32 to vector<8x128xf32>
      %82 = vector.broadcast %cst_38 : f32 to vector<8x128xf32>
      %83 = arith.select %80, %81, %82 : vector<8x128xi1>, vector<8x128xf32>
      %84 = arith.addf %78, %83 : vector<8x128xf32>
      %c3_i32 = arith.constant 3 : i32
      %85 = vector.broadcast %c3_i32 : i32 to vector<8x128xi32>
      %86 = arith.cmpi eq, %67, %85 : vector<8x128xi32>
      %cst_39 = arith.constant 0.000000e+00 : f32
      %87 = vector.broadcast %64 : f32 to vector<8x128xf32>
      %88 = vector.broadcast %cst_39 : f32 to vector<8x128xf32>
      %89 = arith.select %86, %87, %88 : vector<8x128xi1>, vector<8x128xf32>
      %90 = arith.addf %84, %89 : vector<8x128xf32>
      %c0_40 = arith.constant 0 : index
      %c0_41 = arith.constant 0 : index
      %c0_42 = arith.constant 0 : index
      %91 = vector.load %arg8[%c0_40, %c0_41, %c0_42] : memref<1x8x128xf32, #tpu.memory_space<vmem>>, vector<1x8x128xf32>
      %92 = vector.shape_cast %91 : vector<1x8x128xf32> to vector<8x128xf32>
      %93 = vector.shape_cast %90 : vector<8x128xf32> to vector<1x8x128xf32>
      tpu.vector_store %arg8[%c0_40, %c0_41, %c0_42], %93 {strides = array<i32>} : memref<1x8x128xf32, #tpu.memory_space<vmem>>, vector<1x8x128xf32>,
    } else {
    }
    return
  }
  func.func @transform_0(%arg0: i32, %arg1: i32) -> (i32, i32) {
    %c1_i32 = arith.constant 1 : i32
    %0 = arith.muli %arg0, %c1_i32 : i32
    %1 = arith.addi %0, %arg1 : i32
    %c1_i32_0 = arith.constant 1 : i32
    %2 = arith.minsi %1, %c1_i32_0 : i32
    %c0_i32 = arith.constant 0 : i32
    %c0_i32_1 = arith.constant 0 : i32
    return %2, %c0_i32 : i32, i32
  }
  func.func @transform_1(%arg0: i32, %arg1: i32) -> (i32, i32) {
    %c1_i32 = arith.constant 1 : i32
    %0 = arith.muli %arg0, %c1_i32 : i32
    %1 = arith.addi %0, %arg1 : i32
    %c1_i32_0 = arith.constant 1 : i32
    %2 = arith.minsi %1, %c1_i32_0 : i32
    %c0_i32 = arith.constant 0 : i32
    %c0_i32_1 = arith.constant 0 : i32
    return %2, %c0_i32 : i32, i32
  }
  func.func @transform_2(%arg0: i32, %arg1: i32) -> (i32, i32, i32) {
    %c1_i32 = arith.constant 1 : i32
    %0 = arith.muli %arg0, %c1_i32 : i32
    %1 = arith.addi %0, %arg1 : i32
    %c0_i32 = arith.constant 0 : i32
    %2 = arith.minsi %1, %c0_i32 : i32
    %c0_i32_0 = arith.constant 0 : i32
    %c0_i32_1 = arith.constant 0 : i32
    %c0_i32_2 = arith.constant 0 : i32
    return %c0_i32_0, %2, %c0_i32_1 : i32, i32, i32
  }
  func.func @transform_3(%arg0: i32, %arg1: i32) -> (i32, i32, i32) {
    %c1_i32 = arith.constant 1 : i32
    %0 = arith.muli %arg0, %c1_i32 : i32
    %1 = arith.addi %0, %arg1 : i32
    %c0_i32 = arith.constant 0 : i32
    %2 = arith.minsi %1, %c0_i32 : i32
    %c0_i32_0 = arith.constant 0 : i32
    %c0_i32_1 = arith.constant 0 : i32
    %c0_i32_2 = arith.constant 0 : i32
    return %c0_i32_0, %2, %c0_i32_1 : i32, i32, i32
  }
  func.func @transform_4(%arg0: i32, %arg1: i32) -> (i32, i32, i32) {
    %c1_i32 = arith.constant 1 : i32
    %0 = arith.muli %arg0, %c1_i32 : i32
    %1 = arith.addi %0, %arg1 : i32
    %c0_i32 = arith.constant 0 : i32
    %2 = arith.minsi %1, %c0_i32 : i32
    %c0_i32_0 = arith.constant 0 : i32
    %c0_i32_1 = arith.constant 0 : i32
    %c0_i32_2 = arith.constant 0 : i32
    return %c0_i32_0, %2, %c0_i32_1 : i32, i32, i32
  }
  func.func @transform_5(%arg0: i32, %arg1: i32) -> (i32, i32, i32) {
    %c1_i32 = arith.constant 1 : i32
    %0 = arith.muli %arg0, %c1_i32 : i32
    %1 = arith.addi %0, %arg1 : i32
    %c0_i32 = arith.constant 0 : i32
    %2 = arith.minsi %1, %c0_i32 : i32
    %c0_i32_0 = arith.constant 0 : i32
    %c0_i32_1 = arith.constant 0 : i32
    %c0_i32_2 = arith.constant 0 : i32
    return %c0_i32_0, %2, %c0_i32_1 : i32, i32, i32
  }
  func.func @transform_6(%arg0: i32, %arg1: i32) -> (i32, i32, i32) {
    %c0_i32 = arith.constant 0 : i32
    %c0_i32_0 = arith.constant 0 : i32
    %c0_i32_1 = arith.constant 0 : i32
    return %arg0, %c0_i32, %c0_i32_0 : i32, i32, i32
  }
}

</mosaic_0001>

<bundles_post_ra>
// kernel: tpu_custom_call.1
= control target key start
LH: loop header
LB: loop body
LE: loop exit
PB: predicated region body
PF: predicated region fallthrough
CT: control target
= control target key end

     0   :  { %s1425_s0 = inlined_call_operand.vmem [shape: f32[20,32], index: 0, kind: input, shape index: {}]   ;;  %s1426_s1 = inlined_call_operand.vmem [shape: f32[20,32], index: 1, kind: input, shape index: {}]   ;;  %s1427_s2 = inlined_call_operand.vmem [shape: f32[2,5,128], index: 2, kind: input, shape index: {}]   ;;  %s1428_s3 = inlined_call_operand.vmem [shape: f32[2,5,128], index: 3, kind: input, shape index: {}]   ;;  %s1429_s4 = inlined_call_operand.vmem [shape: f32[2,5,128], index: 4, kind: input, shape index: {}]   ;;  %s1430_s5 = inlined_call_operand.vmem [shape: f32[2,5,128], index: 5, kind: input, shape index: {}]   ;;  %s1431_s6 = inlined_call_operand.hbm [shape: f32[2,8,128], index: 6, kind: output, shape index: {}]  }
   0x1   :  { %1437 = sst [smem:[#allocation10_spill]] %s1427_s2 }
   0x2   :  { %11 = vsyncpa [#allocation4], 0 }
   0x3   :  { %13 = vsyncpa [#allocation4 + $0x1], 0  ;;  %s1215_s21 = smov 0   ;;  %s1217_s22 = smov 0  }
   0x4   :  { %s1219_s23 = smov 0   ;;  %s1221_s24 = smov 0  }
   0x5   :  { %s1223_s25 = smov 0   ;;  %s1225_s26 = smov 0  }
   0x6 LB: > { %1438 = sst [smem:[#allocation6_spill]] %s1164_s23  ;;  %s976_s27 = sadd.s32 4294967295, %s1176_s26   ;;  %s1176_s26 = sphi %s1225_s26, %s19_s26   ;;  %s1172_s25 = sphi %s1223_s25, %s1454_s25   ;;  %s1168_s24 = sphi %s1221_s24, %s1450_s24   ;;  %s1164_s23 = sphi %s1219_s23, %s1449_s23   ;;  %s1160_s22 = sphi %s1217_s22, %s1453_s22   ;;  %s1156_s21 = sphi %s1215_s21, %s1452_s21  }
   0x7   : > { %1439 = sst [smem:[#allocation7_spill]] %s1172_s25  ;;  %s977_s28 = sadd.s32 4294967294, %s1176_s26  }
   0x8   : > { %s31_s29 = sadd.s32 1, %s1172_s25  ;;  %s230_s30 = sadd.s32 1, %s1164_s23 }
   0x9   : > { %p33_p0 = scmp.ge.s32.totalorder %s31_s29, 2  ;;  %p240_p1 = scmp.ne.s32.totalorder %s1164_s23, %s1160_s22 }
   0xa   : > { %p241_p2 = scmp.eq.s32.totalorder %s976_s27, 1  ;;  %p246_p3 = scmp.ne.s32.totalorder %s1160_s22, %s1156_s21 }
   0xb   : > { %s1456_s29 = smov (%p33_p0, %s31_s29), 0  ;;  %p247_p5 = scmp.eq.s32.totalorder %s977_s28, 1 }
   0xc   : > { %1440 = sst [smem:[#allocation8_spill]] %s1456_s29  ;;  %p1255_p4 = por %p241_p2, %p240_p1 }
   0xd   : > { %s227_s8 = ssub.s32 %s1172_s25, %s1456_s29  ;;  %p980_p6 = scmp.ge.s32.totalorder %s1176_s26, 1 }
   0xe   : > { %p228_p7 = scmp.eq.s32.totalorder %s227_s8, 0  ;;  %p1262_p8 = por %p247_p5, %p246_p3 }
   0xf   : > { %p363_p9 = scmp.lt.s32.totalorder %s1176_s26, 3 }
  0x10   : > { %s1268_s10 = scalar_select %p228_p7, %s1164_s23, %s230_s30  }
  0x11   : > { %p364_p10 = pnand %p980_p6, %p363_p9 }
  0x12   : > { %1443 = sst [smem:[#allocation9_spill]] %s1268_s10  ;;  %s1432_s11 = sand.u32 (!%p364_p10), 1, %s1160_s22  }
  0x13   : > { %367 = sbr.rel (%p364_p10) target bundleno = 940 (0x3ac), region = 44  ;;  %p441_p11 = scmp.lt.s32.totalorder (!%p364_p10), %s1168_s24, 1 }
  0x14   : > { %s1274_s12 = sshll.u32 (!%p364_p10), %s1432_s11, 3  ;;  %p481_p12 = scmp.lt.s32.totalorder (!%p364_p10), %s1168_s24, 0 }
  0x15   : > { %s532_s13 = sadd.s32 (!%p364_p10), 1, %s1168_s24  ;;  %s1435_s17 = sshll.u32 (!%p364_p10), %s1168_s24, 4 }
  0x16   : > { %s1017_s18 = sadd.s32 (!%p364_p10), 16, %s1435_s17  ;;  %s1444_s2 = sld [smem:[#allocation10_spill]] (!%p364_p10) }
  0x17   : > { %p534_p0 = scmp.gt.s32.totalorder (!%p364_p10), %s1017_s18, 20  ;;  %s535_s8 = smul.u32 (!%p364_p10), 5, %s532_s13 }
  0x18   : > { %v1178_v0 = vmov 0.0   ;;  %s442_s14 = scalar_select %p441_p11, %s1168_s24, 1 }
  0x19   : > { %525 = vst [vmem:[#allocation2] sm:$0xff] %v1178_v0  ;;  %526 = vst [vmem:[#allocation2 + $0x8] sm:$0xff] %v1178_v0  ;;  %s482_s15 = scalar_select %p481_p12, %s1168_s24, 0 }
  0x1a   : > { %527 = vst [vmem:[#allocation2 + $0x10] sm:$0xff] %v1178_v0  ;;  %530 = vst [vmem:[#allocation2 + $0x28] sm:$0xff] %v1178_v0  ;;  %s982_s16 = sshll.u32 %s442_s14, 1  ;;  %p536_p1 = scmp.gt.s32.totalorder %s535_s8, 5 }
  0x1b   : > { %531 = vst [vmem:[#allocation2 + $0x30] sm:$0xff] %v1178_v0  ;;  %p448_p13 = scmp.lt.s32.totalorder %s982_s16, 2  ;;  %s1458_s15 = smov (!%p481_p12, %s482_s15), 0 }
  0x1c   : > { %s989_s19 = sshll.u32 %s1458_s15, 3  ;;  %p537_p2 = por %p536_p1, %p534_p0 }
  0x1d   : > { %s1460_s16 = smov (!%p448_p13, %s982_s16), 2  ;;  %s1290_s30 = scalar_lea.vmem %s1444_s2, %s989_s19 }
  0x1e   : > { %s983_s20 = sshll.u32 %s1460_s16, 3  ;;  %s1305_s15 = scalar_lea.vmem %s1428_s3, %s989_s19 }
  0x1f   : > { %s1295_s14 = scalar_lea.vmem %s1425_s0, %s983_s20  ;;  %s1300_s17 = scalar_lea.vmem %s1426_s1, %s983_s20 }
  0x20   : > { %s1310_s27 = scalar_lea.vmem %s1429_s4, %s989_s19  ;;  %s1315_s11 = scalar_lea.vmem %s1430_s5, %s989_s19 }
  0x21   : > { %p1317_p3 = por %p537_p2, %p536_p1  ;;  %s439_s23 = scalar_lea.vmem [#allocation3], %s1274_s12 }
  0x22   : > { %v542_v1 = vld [vmem:[%s1295_s14] sm:$0xff] (%p1317_p3)  ;;  %vm546_vm0 = vcmask (%p1317_p3), 261120   ;;  %v543_v2 = vld [vmem:[%s1295_s14 + $0x8] sm:$0xff] (%p1317_p3)  ;;  %v589_v23 = vlaneseq (%p1317_p3)  ;;  %s605_s2 = smul.u32 (%p1317_p3), 5, %s1168_s24  ;;  %v628_v41 = vld [vmem:[#allocation2 + $0x10] sm:$0x1f] (%p1317_p3) }
  0x23   : > { %541 = sbr.rel (!%p1317_p3) target bundleno = 363 (0x16b), region = 52  ;;  %v547_v3 = vsel (%p1317_p3), %vm546_vm0, %v542_v1, -inf  ;;  %v550_v4 = vsel (%p1317_p3), %vm546_vm0, %v543_v2, -inf  ;;  %v544_v5 = vld [vmem:[%s1300_s17] sm:$0xff] (%p1317_p3)  ;;  %v545_v18 = vld [vmem:[%s1300_s17 + $0x8] sm:$0xff] (%p1317_p3)  ;;  %s1446_s29 = sshll.u32 (%p1317_p3), %s1168_s24, 4 }
  0x24   : > { %548 = vmax.xlane.f32.xlu0 (%p1317_p3), %v547_v3  ;;  %v569_v6 = vsel (%p1317_p3), %vm546_vm0, %v544_v5, 0.0  ;;  %v579_v7 = vmul.f32 (%p1317_p3), %v544_v5, %v542_v1  ;;  %v572_v20 = vsel (%p1317_p3), %vm546_vm0, %v545_v18, 0.0  ;;  %v580_v21 = vmul.f32 (%p1317_p3), %v545_v18, %v543_v2  ;;  %v609_v26 = vld [vmem:[%s1290_s30] sm:$0x1f] (%p1317_p3)  ;;  %v1004_v27 = vld [vmem:[%s1290_s30 + $0x8] sm:$0x1f] (%p1317_p3) }
  0x25   : > { %v590_v24 = vshrl.u32 (%p1317_p3), %v589_v23, 7  ;;  %v606_v25 = vstv (%p1317_p3), %s605_s2  ;;  %v612_v28 = vld [vmem:[%s1305_s15] sm:$0x1f] (%p1317_p3)  ;;  %v1005_v30 = vld [vmem:[%s1305_s15 + $0x8] sm:$0x1f] (%p1317_p3)  ;;  %v615_v31 = vsub.f32 (%p1317_p3), %v609_v26, %v1004_v27  ;;  %v593_v63 = vstv (%p1317_p3), %s1446_s29 }
  0x26   : > { %v581_v8 = vsel (%p1317_p3), %vm546_vm0, %v579_v7, 0.0  ;;  %v584_v22 = vsel (%p1317_p3), %vm546_vm0, %v580_v21, 0.0  ;;  %v624_v32 = vsub.f32 (%p1317_p3), %v612_v28, %v1005_v30  ;;  %v631_v33 = vld [vmem:[%s1310_s27] sm:$0x1f] (%p1317_p3)  ;;  %v1006_v34 = vld [vmem:[%s1310_s27 + $0x8] sm:$0x1f] (%p1317_p3) }
  0x27   : > { %v607_v29 = vadd.s32 (%p1317_p3), %v606_v25, %v590_v24  ;;  %v634_v35 = vld [vmem:[%s1315_s11] sm:$0x1f] (%p1317_p3)  ;;  %v1007_v36 = vld [vmem:[%s1315_s11 + $0x8] sm:$0x1f] (%p1317_p3)  ;;  %v637_v37 = vsub.f32 (%p1317_p3), %v631_v33, %v1006_v34  ;;  %v648_v48 = vld [vmem:[#allocation2 + $0x30] sm:$0x1f] (%p1317_p3)  ;;  %v594_v3 = vadd.s32 (%p1317_p3), %v593_v63, %v590_v24 }
  0x28   : > { %551 = vmax.xlane.f32.xlu0 %v550_v4  ;;  %v621_v39 = vld [vmem:[#allocation2 + $0x8] sm:$0x1f]  ;;  %v644_v42 = vsub.f32 %v634_v35, %v1007_v36  ;;  %v591_v61 = vadd.s32 8, %v590_v24  ;;  %vm603_vm4 = vcmask 7168  }
  0x29   : > { %vm608_vm1 = vcmp.lt.s32.totalorder %v607_v29, 5  ;;  %v638_v45 = vand.u32 2147483647, %v637_v37  ;;  %v641_v46 = vld [vmem:[#allocation2 + $0x28] sm:$0x1f]  ;;  %vm596_vm2 = vcmp.lt.s32.totalorder %v594_v3, 20 }
  0x2a   : > { %v618_v38 = vsel %vm608_vm1, %v615_v31, 0.0  ;;  %v625_v40 = vsel %vm608_vm1, %v624_v32, 0.0  ;;  %v645_v47 = vand.u32 2147483647, %v644_v42  ;;  %v595_v5 = vadd.s32 %v593_v63, %v591_v61 }
  0x2b   : > { %v619_v43 = vmul.f32 %v618_v38, %v618_v38  ;;  %v626_v44 = vmul.f32 %v625_v40, %v625_v40  ;;  %v639_v51 = vsel %vm608_vm1, %v638_v45, 0.0 }
  0x2c   : > { %570 = vadd.xlane.f32.xlu0 %v569_v6  ;;  %v642_v52 = vadd.f32 %v641_v46, %v639_v51  ;;  %v646_v53 = vsel %vm608_vm1, %v645_v47, 0.0  ;;  %vm597_vm3 = vcmp.lt.s32.totalorder %v595_v5, 20 }
  0x2d   : > { %v622_v49 = vadd.f32 %v621_v39, %v619_v43  ;;  %v629_v50 = vadd.f32 %v628_v41, %v626_v44  ;;  %v649_v54 = vadd.f32 %v648_v48, %v646_v53 }
  0x2e   : > { %643 = vst [vmem:[#allocation2 + $0x28] sm:$0x1f] %v642_v52 }
  0x2f   : > { %623 = vst [vmem:[#allocation2 + $0x8] sm:$0x1f] %v622_v49  ;;  %630 = vst [vmem:[#allocation2 + $0x10] sm:$0x1f] %v629_v50 }
  0x30   : > { %582 = vadd.xlane.f32.xlu0 %v581_v8  ;;  %650 = vst [vmem:[#allocation2 + $0x30] sm:$0x1f] %v649_v54 }
  0xad   : > { %v1331_v9 = vpop.xlane.xlu0 %548 }
  0xae   : > { %v553_v10 = vsub.f32 %v542_v1, %v1331_v9 }
  0xb0   : > { %v555_v11 = vmul.f32 1.442695, %v553_v10 }
  0xb1   : > { %v1334_v12 = vpop.xlane.xlu0 %551 }
  0xb2   : > { %1084 = vpow2.f32 %v555_v11  ;;  %v554_v13 = vsub.f32 %v543_v2, %v1334_v12 }
  0xb4   : > { %v557_v14 = vmul.f32 1.442695, %v554_v13 }
  0xb5   : > { %v571_v58 = vpop.xlane.xlu0 %570 }
  0xb6   : > { %1086 = vpow2.f32 %v557_v14  ;;  %v601_v14 = vld [vmem:[#allocation2] sm:$0xff] }
  0xb9   : > { %v583_v4 = vpop.xlane.xlu0 %582 }
  0xbf   : > { %v1085_v15 = vpop.eup %1084 }
  0xc0   : > { %v559_v16 = vsel %vm546_vm0, %v1085_v15, 0.0 }
  0xc1   : > { %560 = vadd.xlane.f32.xlu1 %v559_v16 }
  0xc3   : > { %v1087_v17 = vpop.eup %1086 }
  0xc4   : > { %v562_v19 = vsel %vm546_vm0, %v1087_v17, 0.0 }
  0xc5   : > { %563 = vadd.xlane.f32.xlu1 %v562_v19 }
  0xc9   : > { %573 = vadd.xlane.f32.xlu1 %v572_v20 }
  0xcd   : > { %585 = vadd.xlane.f32.xlu1 %v584_v22 }
 0x14a   : > { %v561_v55 = vpop.xlane.xlu1 %560 }
 0x14b   : > { %1088 = vlog2.f32 %v561_v55 }
 0x14e   : > { %v564_v56 = vpop.xlane.xlu1 %563 }
 0x14f   : > { %1090 = vlog2.f32 %v564_v56 }
 0x152   : > { %v574_v60 = vpop.xlane.xlu1 %573 }
 0x156   : > { %v586_v7 = vpop.xlane.xlu1 %585 }
 0x158   : > { %v1089_v57 = vpop.eup %1088 }
 0x159   : > { %v566_v59 = vmul.f32 0.6931472, %v1089_v57 }
 0x15b   : > { %v575_v62 = vadd.f32 %v566_v59, %v1331_v9 }
 0x15c   : > { %v1091_v0 = vpop.eup %1090 }
 0x15d   : > { %v568_v1 = vmul.f32 0.6931472, %v1091_v0  ;;  %v577_v2 = vmul.f32 %v575_v62, %v571_v58 }
 0x15f   : > { %v576_v6 = vadd.f32 %v568_v1, %v1334_v12  ;;  %v587_v10 = vsub.f32 %v577_v2, %v583_v4 }
 0x161   : > { %v578_v8 = vmul.f32 %v576_v6, %v574_v60  ;;  %v598_v13 = vsel %vm596_vm2, %v587_v10, 0.0 }
 0x163   : > { %v588_v11 = vsub.f32 %v578_v8, %v586_v7 }
 0x165   : > { %v599_v15 = vsel %vm597_vm3, %v588_v11, 0.0 }
 0x166   : > { %v600_v9 = vadd.f32 %v599_v15, %v598_v13 }
 0x168   : > { %v602_v16 = vadd.f32 %v601_v14, %v600_v9 }
 0x16a   : > { %604 = vst.msk [vmem:[#allocation2] sm:$0xff] %vm603_vm4, %v602_v16 }
 0x16b PF: > { %653 = sbr.rel (%p1317_p3) target bundleno = 696 (0x2b8), region = 56 }
 0x170   : > { %v654_v12 = vld [vmem:[%s1295_s14] sm:$0xff]  ;;  %vm658_vm5 = vcmask 261120   ;;  %v655_v17 = vld [vmem:[%s1295_s14 + $0x8] sm:$0xff]  ;;  %v721_v53 = vld [vmem:[#allocation2 + $0x10] sm:$0x1f]  ;;  %vm704_vm6 = vcmask 7168  }
 0x171   : > { %v659_v18 = vsel %vm658_vm5, %v654_v12, -inf  ;;  %v662_v19 = vsel %vm658_vm5, %v655_v17, -inf  ;;  %v656_v20 = vld [vmem:[%s1300_s17] sm:$0xff]  ;;  %v657_v33 = vld [vmem:[%s1300_s17 + $0x8] sm:$0xff]  ;;  %v739_v58 = vld [vmem:[#allocation2 + $0x30] sm:$0x1f] }
 0x172   : > { %660 = vmax.xlane.f32.xlu0 %v659_v18  ;;  %v681_v21 = vsel %vm658_vm5, %v656_v20, 0.0  ;;  %v691_v22 = vmul.f32 %v656_v20, %v654_v12  ;;  %v684_v35 = vsel %vm658_vm5, %v657_v33, 0.0  ;;  %v692_v36 = vmul.f32 %v657_v33, %v655_v17  ;;  %v706_v38 = vld [vmem:[%s1290_s30] sm:$0x1f]  ;;  %v1008_v39 = vld [vmem:[%s1290_s30 + $0x8] sm:$0x1f] }
 0x173   : > { %v709_v40 = vld [vmem:[%s1305_s15] sm:$0x1f]  ;;  %v1009_v41 = vld [vmem:[%s1305_s15 + $0x8] sm:$0x1f]  ;;  %v712_v42 = vsub.f32 %v706_v38, %v1008_v39 }
 0x174   : > { %v693_v23 = vsel %vm658_vm5, %v691_v22, 0.0  ;;  %v696_v37 = vsel %vm658_vm5, %v692_v36, 0.0  ;;  %v724_v43 = vld [vmem:[%s1310_s27] sm:$0x1f]  ;;  %v1010_v44 = vld [vmem:[%s1310_s27 + $0x8] sm:$0x1f]  ;;  %v718_v45 = vsub.f32 %v709_v40, %v1009_v41 }
 0x175   : > { %v727_v46 = vld [vmem:[%s1315_s11] sm:$0x1f]  ;;  %v1011_v47 = vld [vmem:[%s1315_s11 + $0x8] sm:$0x1f]  ;;  %v730_v48 = vsub.f32 %v724_v43, %v1010_v44  ;;  %v713_v49 = vmul.f32 %v712_v42, %v712_v42 }
 0x176   : > { %663 = vmax.xlane.f32.xlu0 %v662_v19  ;;  %v736_v50 = vsub.f32 %v727_v46, %v1011_v47  ;;  %v715_v51 = vld [vmem:[#allocation2 + $0x8] sm:$0x1f]  ;;  %v719_v52 = vmul.f32 %v718_v45, %v718_v45  ;;  %v702_v9 = vld [vmem:[#allocation2] sm:$0xff] }
 0x177   : > { %v731_v54 = vand.u32 2147483647, %v730_v48  ;;  %v716_v55 = vadd.f32 %v715_v51, %v713_v49  ;;  %v733_v56 = vld [vmem:[#allocation2 + $0x28] sm:$0x1f] }
 0x178   : > { %v737_v57 = vand.u32 2147483647, %v736_v50  ;;  %v722_v59 = vadd.f32 %v721_v53, %v719_v52 }
 0x179   : > { %v734_v60 = vadd.f32 %v733_v56, %v731_v54  ;;  %717 = vst [vmem:[#allocation2 + $0x8] sm:$0x1f] %v716_v55 }
 0x17a   : > { %682 = vadd.xlane.f32.xlu0 %v681_v21  ;;  %v740_v61 = vadd.f32 %v739_v58, %v737_v57  ;;  %723 = vst [vmem:[#allocation2 + $0x10] sm:$0x1f] %v722_v59 }
 0x17b   : > { %735 = vst [vmem:[#allocation2 + $0x28] sm:$0x1f] %v734_v60 }
 0x17c   : > { %741 = vst [vmem:[#allocation2 + $0x30] sm:$0x1f] %v740_v61 }
 0x17e   : > { %694 = vadd.xlane.f32.xlu0 %v693_v23 }
 0x1fb   : > { %v661_v24 = vpop.xlane.xlu0 %660 }
 0x1fc   : > { %v665_v25 = vsub.f32 %v654_v12, %v661_v24 }
 0x1fe   : > { %v667_v26 = vmul.f32 1.442695, %v665_v25 }
 0x1ff   : > { %v664_v27 = vpop.xlane.xlu0 %663 }
 0x200   : > { %1092 = vpow2.f32 %v667_v26  ;;  %v666_v28 = vsub.f32 %v655_v17, %v664_v27 }
 0x202   : > { %v669_v29 = vmul.f32 1.442695, %v666_v28 }
 0x203   : > { %v683_v2 = vpop.xlane.xlu0 %682 }
 0x204   : > { %1094 = vpow2.f32 %v669_v29 }
 0x207   : > { %v695_v10 = vpop.xlane.xlu0 %694 }
 0x20d   : > { %v1093_v30 = vpop.eup %1092 }
 0x20e   : > { %v671_v31 = vsel %vm658_vm5, %v1093_v30, 0.0 }
 0x20f   : > { %672 = vadd.xlane.f32.xlu1 %v671_v31 }
 0x211   : > { %v1095_v32 = vpop.eup %1094 }
 0x212   : > { %v674_v34 = vsel %vm658_vm5, %v1095_v32, 0.0 }
 0x213   : > { %675 = vadd.xlane.f32.xlu1 %v674_v34 }
 0x217   : > { %685 = vadd.xlane.f32.xlu1 %v684_v35 }
 0x21b   : > { %697 = vadd.xlane.f32.xlu1 %v696_v37 }
 0x298   : > { %v673_v62 = vpop.xlane.xlu1 %672 }
 0x299   : > { %1096 = vlog2.f32 %v673_v62 }
 0x29c   : > { %v676_v63 = vpop.xlane.xlu1 %675 }
 0x29d   : > { %1098 = vlog2.f32 %v676_v63 }
 0x2a0   : > { %v686_v3 = vpop.xlane.xlu1 %685 }
 0x2a4   : > { %v698_v11 = vpop.xlane.xlu1 %697 }
 0x2a6   : > { %v1097_v0 = vpop.eup %1096 }
 0x2a7   : > { %v678_v1 = vmul.f32 0.6931472, %v1097_v0 }
 0x2a9   : > { %v687_v4 = vadd.f32 %v678_v1, %v661_v24 }
 0x2aa   : > { %v1099_v5 = vpop.eup %1098 }
 0x2ab   : > { %v680_v6 = vmul.f32 0.6931472, %v1099_v5  ;;  %v689_v7 = vmul.f32 %v687_v4, %v683_v2 }
 0x2ad   : > { %v688_v8 = vadd.f32 %v680_v6, %v664_v27  ;;  %v699_v14 = vsub.f32 %v689_v7, %v695_v10 }
 0x2af   : > { %v690_v13 = vmul.f32 %v688_v8, %v686_v3 }
 0x2b1   : > { %v700_v15 = vsub.f32 %v690_v13, %v698_v11 }
 0x2b3   : > { %v701_v16 = vadd.f32 %v700_v15, %v699_v14 }
 0x2b5   : > { %v703_v12 = vadd.f32 %v702_v9, %v701_v16 }
 0x2b7   : > { %705 = vst.msk [vmem:[#allocation2] sm:$0xff] %vm704_vm6, %v703_v12 }
 0x2b8 PF: > { %v773_v17 = vld [vmem:[#allocation2 + $0x10] sm:$0xff]  ;;  %v789_v19 = vld [vmem:[#allocation2 + $0x28] sm:$0xff]  ;;  %v817_v57 = vlaneseq  ;;  %s1013_s2 = sshll.u32 %s1168_s24, 7  ;;  %s849_s29 = sshll.u32 %s439_s23, 4  ;;  %s850_s29 = int_to_ptr.vmem [resolvable:$true] %s849_s29 }
 0x2b9   : > { %774 = vadd.xlane.f32.xlu1 %v773_v17  ;;  %v759_v20 = vld [vmem:[#allocation2 + $0x8] sm:$0xff]  ;;  %v800_v21 = vld [vmem:[#allocation2 + $0x30] sm:$0xff]  ;;  %s1179_s24 = smov [#allocation3]  }
 0x2ba   : > { %v818_v58 = vand.u32 127, %v817_v57 }
 0x2bc   : > { %vm822_vm7 = vcmp.eq.s32.totalorder %v818_v58, 1  ;;  %vm819_vm8 = vcmp.eq.s32.totalorder %v818_v58, 0  ;;  %vm826_vm9 = vcmp.eq.s32.totalorder %v818_v58, 2  ;;  %vm830_vm10 = vcmp.eq.s32.totalorder %v818_v58, 3 }
 0x2bd   : > { %790 = vadd.xlane.f32.xlu1 %v789_v19 }
 0x2be   : > { %v745_v18 = vld [vmem:[#allocation2] sm:$0xff] }
 0x2bf   : > { %746 = vadd.xlane.f32.xlu0 %v745_v18 }
 0x2c3   : > { %760 = vadd.xlane.f32.xlu0 %v759_v20 }
 0x2c7   : > { %801 = vadd.xlane.f32.xlu0 %v800_v21 }
 0x342   : > { %v775_v22 = vpop.xlane.xlu1 %774 }
 0x343   : > { %v776_v24 = vrot.slane %v775_v22, 4 }
 0x345   : > { %v777_v26 = vadd.f32 %v776_v24, %v775_v22 }
 0x346   : > { %v791_v28 = vpop.xlane.xlu1 %790 }
 0x347   : > { %v778_v30 = vrot.slane %v777_v26, 2  ;;  %v792_v32 = vrot.slane %v791_v28, 4 }
 0x348   : > { %v747_v23 = vpop.xlane.xlu0 %746 }
 0x349   : > { %v748_v25 = vrot.slane %v747_v23, 4  ;;  %v793_v34 = vadd.f32 %v792_v32, %v791_v28  ;;  %v779_v38 = vadd.f32 %v778_v30, %v777_v26 }
 0x34b   : > { %v749_v27 = vadd.f32 %v748_v25, %v747_v23  ;;  %v794_v39 = vrot.slane %v793_v34, 2  ;;  %v780_v47 = vrot.slane %v779_v38, 1 }
 0x34c   : > { %v761_v29 = vpop.xlane.xlu0 %760 }
 0x34d   : > { %v750_v31 = vrot.slane %v749_v27, 2  ;;  %v762_v33 = vrot.slane %v761_v29, 4  ;;  %v795_v43 = vadd.f32 %v794_v39, %v793_v34  ;;  %v781_v54 = vadd.f32 %v780_v47, %v779_v38 }
 0x34f   : > { %v763_v35 = vadd.f32 %v762_v33, %v761_v29  ;;  %v751_v36 = vadd.f32 %v750_v31, %v749_v27  ;;  %v796_v50 = vrot.slane %v795_v43, 1 }
 0x350   : > { %v802_v37 = vpop.xlane.xlu0 %801 }
 0x351   : > { %v764_v40 = vrot.slane %v763_v35, 2  ;;  %v803_v41 = vrot.slane %v802_v37, 4  ;;  %v752_v42 = vrot.slane %v751_v36, 1  ;;  %v797_v53 = vadd.f32 %v796_v50, %v795_v43 }
 0x353   : > { %v804_v44 = vadd.f32 %v803_v41, %v802_v37  ;;  %v753_v45 = vadd.f32 %v752_v42, %v751_v36  ;;  %v765_v46 = vadd.f32 %v764_v40, %v763_v35 }
 0x355   : > { %v805_v48 = vrot.slane %v804_v44, 2  ;;  %1018 = vpush %v753_v45  ;;  %v766_v49 = vrot.slane %v765_v46, 1 }
 0x357   : > { %v806_v51 = vadd.f32 %v805_v48, %v804_v44  ;;  %v767_v52 = vadd.f32 %v766_v49, %v765_v46 }
 0x359   : > { %1020 = vpush %v767_v52  ;;  %v807_v55 = vrot.slane %v806_v51, 1 }
 0x35a   : > { %1022 = vpush %v781_v54 }
 0x35b   : > { %1024 = vpush %v797_v53  ;;  %v808_v56 = vadd.f32 %v807_v55, %v806_v51 }
 0x35d   : > { %1026 = vpush %v808_v56 }
 0x386   : > { %s1019_s10 = spop %1018 }
 0x387   : > { %s757_s16 = smul.f32 0.05, %s1019_s10 }
 0x389   : > { %v823_v59 = vstv %s757_s16 }
 0x38a   : > { %s1021_s13 = spop %1020  ;;  %v824_v62 = vsel %vm822_vm7, %v823_v59, 0.0 }
 0x38b   : > { %s771_s17 = smul.f32 0.0015625, %s1021_s13  ;;  %s1023_s19 = spop %1022 }
 0x38c   : > { %s785_s20 = smul.f32 0.0015625, %s1023_s19  ;;  %s1025_s30 = spop %1024 }
 0x38d   : > { %s1447_s19 = sand.u32 1, %s1160_s22  }
 0x38e   : > { %s786_s14 = sadd.f32 %s785_s20, %s771_s17  ;;  %s1027_s15 = spop %1026 }
 0x38f   : > { %s810_s18 = sadd.f32 %s1027_s15, %s1025_s30  ;;  %s847_s17 = scalar_lea.hbm %s1431_s6, %s1013_s2 }
 0x390   : > { %s787_s27 = smul.f32 0.5, %s786_s14  ;;  %s836_s20 = scalar_lea.sflag [#allocation4], %s1447_s19 }
 0x391   : > { %s811_s28 = smul.f32 0.5, %s810_s18  ;;  %s1100_s30 = scalar_lea.vmem %s850_s29, 128 }
 0x392   : > { %s815_s11 = sadd.f32 %s787_s27, %s757_s16  ;;  %v827_v60 = vstv %s787_s27  ;;  %p1101_p5 = scmp.ne.s32.totalorder %s850_s29, %s1100_s30 }
 0x393   : > { %s814_s8 = smul.f32 0.0015625, %s811_s28  ;;  %v828_v2 = vsel %vm826_vm9, %v827_v60, 0.0  ;;  %s1104_s14 = sshll.u32 %s1179_s24, 4  ;;  %s1105_s14 = int_to_ptr.vmem [resolvable:$false] %s1104_s14 }
 0x394   : > { %p1102_p6 = pnand %p1101_p5, %p1255_p4  ;;  %s1106_s15 = scalar_lea.vmem %s1105_s14, 256 }
 0x395   : > { %s816_s25 = sadd.f32 %s815_s11, %s814_s8  ;;  %v831_v1 = vstv %s814_s8  ;;  %p1107_p9 = scmp.lt.s32.totalorder %s850_s29, %s1105_s14 }
 0x396   : > { %v832_v4 = vsel %vm830_vm10, %v831_v1, 0.0  ;;  %p1103_p7 = pneg %p1102_p6  ;;  %p1108_p10 = scmp.lt.s32.totalorder %s1106_s15, %s1100_s30 }
 0x397   : > { %v820_v61 = vstv %s816_s25 }
 0x398   : > { %v821_v63 = vsel %vm819_vm8, %v820_v61, 0.0  ;;  %p1109_p11 = por %p1108_p10, %p1107_p9 }
 0x399   : > { %v825_v0 = vadd.f32 %v824_v62, %v821_v63 }
 0x39a   : > { %p1110_p12 = pnand %p1109_p11, %p1103_p7 }
 0x39b   : > { %v829_v3 = vadd.f32 %v828_v2, %v825_v0 }
 0x39d   : > { %v833_v5 = vadd.f32 %v832_v4, %v829_v3 }
 0x39f   : > { %834 = vst [vmem:[%s439_s23] sm:$0xff] %v833_v5 }
 0x3a0   : > { %1113 = shalt.err (!%p1110_p12)
}
 0x3a1   : > { %s1114_s16 = scalar_lea.hbm %s847_s17, 128  ;;  %s1118_s18 = scalar_lea.hbm %s1431_s6, 256 }
 0x3a2   : > { %p1115_p13 = scmp.ne.s32.totalorder %s847_s17, %s1114_s16  ;;  %p1119_p2 = scmp.lt.s32.totalorder %s847_s17, %s1431_s6 }
 0x3a3   : > { %p1120_p3 = scmp.lt.s32.totalorder %s1118_s18, %s1114_s16 }
 0x3a4   : > { %p1116_p0 = pnand %p1115_p13, %p1255_p4 }
 0x3a5   : > { %p1121_p5 = por %p1120_p3, %p1119_p2 }
 0x3a6   : > { %p1117_p1 = pneg %p1116_p0 }
 0x3a8   : > { %p1122_p6 = pnand %p1121_p5, %p1117_p1 }
 0x3aa   : > { %1125 = shalt.err (!%p1122_p6)
}
 0x3ab   : > { %1028 = dma.vmem_to_hbm [thread:$0]  (%p1255_p4), %s850_s29, 128, %s847_s17, %s836_s20  }
 0x3ac PF: > { %p1034_p7 = scmp.ge.s32.totalorder %s1176_s26, 2  ;;  %s861_s11 = sand.u32 1, %s1156_s21  }
 0x3ad   : > { %s862_s8 = scalar_lea.sflag [#allocation4], %s861_s11 }
 0x3ae   : > { %p1031_p9 = pnand %p1034_p7, %p1262_p8 }
 0x3b0   : > { %p1032_p10 = pneg %p1031_p9 }
 0x3b2   : > { %1151 = dma.done.wait (%p1032_p10), %s862_s8, 128  }
 0x3b3   : > { %1153 = vsyncadd (%p1032_p10), %s862_s8, 4294967168  ;;  %s19_s26 = sadd.s32 1, %s1176_s26   ;;  %s1448_s25 = sld [smem:[#allocation6_spill]] }
 0x3b4   : > { %p16_p11 = scmp.ge.s32.totalorder %s19_s26, 4   ;;  %s1449_s23 = sld [smem:[#allocation9_spill]] }
 0x3b5   : > { %s1450_s24 = sld [smem:[#allocation7_spill]]  ;;  %s1452_s21 = smov %s1160_s22 }
 0x3b6   : > { %s1451_s7 = sld [smem:[#allocation8_spill]] }
 0x3b8   :  { %18 = sbr.rel (!%p16_p11) target bundleno = 6 (0x6), region = 130 }
 0x3b9   : > { %s1453_s22 = smov %s1448_s25 }
 0x3bc   : > { %s1454_s25 = smov %s1451_s7 }
 0x3bd   :  { %867 = vsyncpa [#allocation4], 1 }
 0x3be   :  { %869 = vsyncpa [#allocation4 + $0x1], 1 }

</bundles_post_ra>
